<compile_context>
chip_gen: v7x
topology: tpu7x:2x2x1
jax: 0.10.0
libtpu: 0.0.40
codegen_flags: <defaults>
</compile_context>

<pallas_src>
import math
import jax
import jax.numpy as jnp
from jax.experimental import pallas as pl
from jax.experimental.pallas import tpu as pltpu

# ----------------------------- configuration -------------------------------
CONFIG = dict(
    use_viewdirs=True,
    hidden_dim_sigma=64,
    num_layers_sigma=2,
    hidden_dim_color=64,
    num_layers_color=3,
    # HashEncoder (Instant-NGP style) hyper-parameters
    hash_levels=4,
    hash_features_per_level=2,
    hash_table_size=2 ** 12,
    hash_base_resolution=16,
    hash_growth_factor=1.5,
)

LANES = 128      # weight-slab lane width
TM_ALIGN = 128   # point-tile granularity (lane dim of the blocks)


def _round_up(x, m):
    return (x + m - 1) // m * m


def _device_defaults():
    """(max points per grid step, vmem_limit_bytes) per TPU generation."""
    kind = ""
    try:
        kind = jax.devices()[0].device_kind.lower()
    except Exception:
        pass
    if "v5" in kind or "v6" in kind:        # 128 MiB VMEM chips
        return 8192, 64 * 1024 * 1024
    if "v7" in kind or "7x" in kind:        # 64 MiB VMEM per TensorCore
        return 4096, 48 * 1024 * 1024
    return 2048, None                       # unknown: conservative defaults


def _pick_tm(n, max_tm):
    tm = min(max_tm, _round_up(max(n, 1), TM_ALIGN))
    # ensure >=2 grid steps when possible so v7x's second TensorCore gets work
    if _round_up(n, tm) // tm < 2 and n > TM_ALIGN:
        tm = _round_up(-(-n // 2), TM_ALIGN)
    return tm


# ----------------------- HashEncoder (plain-JAX glue) ----------------------
# TODO(synk): the per-corner hash-table gather is data-dependent indexing and
# stays in plain JAX; only the dense MLP hot path runs in the Pallas kernel.
def hash_encode(pts, tables, resolutions):
    """pts: (N, 3) in [0,1]^3; tables: (L, T, F); returns (N, L*F) float32."""
    L, T, F = tables.shape
    primes = jnp.array([1, 2654435761, 805459861], dtype=jnp.uint32)
    outs = []
    for lvl in range(L):
        res = float(resolutions[lvl])
        x = pts.astype(jnp.float32) * res
        x0 = jnp.floor(x)
        w = x - x0                                   # (N, 3) trilinear weights
        x0i = x0.astype(jnp.int32)
        acc = jnp.zeros((pts.shape[0], F), dtype=jnp.float32)
        for c in range(8):
            offs = jnp.array([(c >> 0) & 1, (c >> 1) & 1, (c >> 2) & 1],
                             dtype=jnp.int32)
            corner = (x0i + offs[None, :]).astype(jnp.uint32)
            h = corner * primes[None, :]
            idx = (h[:, 0] ^ h[:, 1] ^ h[:, 2]) % jnp.uint32(T)
            feats = tables[lvl][idx.astype(jnp.int32)]              # (N, F)
            wgt = jnp.prod(jnp.where(offs[None, :] == 1, w, 1.0 - w),
                           axis=-1, keepdims=True)                  # (N, 1)
            acc = acc + wgt * feats
        outs.append(acc)
    return jnp.concatenate(outs, axis=-1)


# --------------------------- weight-slab layout -----------------------------
# Feature-major ("transposed") layout: every weight block is stored as
# (out_features rows, in_features lanes), so the kernel computes  W @ act  with
# the point axis on lanes.  Bias folding / channel propagation:
#   input rows      : [enc (d_enc) | dirs (3) | 1]
#   fused outputs   : [color-h1 (hdc) | ones | sigma]
#   layer-2 outputs : [color-h2 (hdc) | ones | sigma]
#   final outputs   : [sigma | r | g | b]
def make_layout(d_enc, hd, hdc):
    d_in = d_enc + 4                  # [enc | dirs | 1]
    na = hdc + 2                      # [h | ones | sigma]
    assert hd <= LANES and na <= LANES and d_in <= LANES
    r_w1 = 0                                   # W1t      (hd, d_in)
    r_waf = _round_up(r_w1 + hd, 16)           # Wa_feat  (na, hd)
    r_wad = _round_up(r_waf + na, 16)          # Wa_dir   (na, 4)
    r_w2 = _round_up(r_wad + na, 16)           # W2t      (na, na)
    r_w3 = _round_up(r_w2 + na, 16)            # W3t      (4, na)
    rows = _round_up(r_w3 + 4, 16)
    return dict(d_enc=d_enc, hd=hd, hdc=hdc, d_in=d_in, na=na,
                r_w1=r_w1, r_waf=r_waf, r_wad=r_wad, r_w2=r_w2, r_w3=r_w3,
                rows=rows)


# ------------------------------ Pallas kernel -------------------------------
def make_nerf_kernel(layout):
    d_enc, hd, hdc = layout["d_enc"], layout["hd"], layout["hdc"]
    d_in, na = layout["d_in"], layout["na"]
    r_w1, r_waf, r_wad = layout["r_w1"], layout["r_waf"], layout["r_wad"]
    r_w2, r_w3 = layout["r_w2"], layout["r_w3"]

    def kernel(x_ref, w_ref, out_ref):
        x = x_ref[...]                                     # (d_in, TM) bf16

        # sigma hidden layer: feat = ReLU(W1t @ x)  (b1 folded via the ones row)
        w1t = w_ref[r_w1:r_w1 + hd, 0:d_in]
        feat = jnp.maximum(
            jnp.dot(w1t, x, preferred_element_type=jnp.float32), 0.0)  # (hd,TM)

        # F.normalize(dirs, p=2, eps=1e-12) in f32 via rsqrt (EUP slot)
        d4 = x[d_enc:d_enc + 4, :].astype(jnp.float32)     # [dx, dy, dz, 1]
        sumsq = jnp.sum(d4[0:3, :] * d4[0:3, :], axis=0, keepdims=True)
        inv = jax.lax.rsqrt(jnp.maximum(sumsq, 1e-24))
        row4 = jax.lax.broadcasted_iota(jnp.int32, (4, 1), 0)
        d4n = d4 * jnp.where(row4 < 3, inv, 1.0)           # [dirs_n | 1]

        # fused (color layer 1 | ones | sigma output) as two summed dots
        # (replaces the old [feat, dirs, pad] concatenate)
        waf = w_ref[r_waf:r_waf + na, 0:hd]
        wad = w_ref[r_wad:r_wad + na, 0:4]
        z = (jnp.dot(waf, feat.astype(jnp.bfloat16),
                     preferred_element_type=jnp.float32)
             + jnp.dot(wad, d4n.astype(jnp.bfloat16),
                       preferred_element_type=jnp.float32))
        zr = jnp.maximum(z, 0.0)                           # (na, TM): [h1|1|sigma]

        # color layer 2 (bias + ones/sigma pass-through folded into W2t)
        w2t = w_ref[r_w2:r_w2 + na, 0:na]
        h2 = jnp.maximum(
            jnp.dot(w2t, zr.astype(jnp.bfloat16),
                    preferred_element_type=jnp.float32), 0.0)  # [h2|1|sigma]

        # color output + sigma pass-through: rows = [sigma | r | g | b]
        w3t = w_ref[r_w3:r_w3 + 4, 0:na]
        z3 = jnp.dot(w3t, h2.astype(jnp.bfloat16),
                     preferred_element_type=jnp.float32)       # (4, TM)

        # sigmoid on rgb rows only; sigma row passes through unchanged
        out_ref[...] = jnp.where(row4 == 0, z3, jax.nn.sigmoid(z3))

    return kernel


def nerf_mlp_pallas(x_t, wslab, layout, tm, vmem_limit):
    """x_t: (d_in, N_pad) bf16 = [enc | dirs | 1] per column; returns (4, N_pad) f32."""
    d_in, n = x_t.shape
    assert d_in == layout["d_in"] and n % tm == 0
    kernel = make_nerf_kernel(layout)
    return pl.pallas_call(
        kernel,
        out_shape=jax.ShapeDtypeStruct((4, n), jnp.float32),
        grid_spec=pltpu.PrefetchScalarGridSpec(
            num_scalar_prefetch=0,
            grid=(n // tm,),
            in_specs=[
                # lane-dense point tile
                pl.BlockSpec((d_in, tm), lambda i: (0, i)),
                # resident weight slab (constant index -> fetched once, no re-DMA)
                pl.BlockSpec(wslab.shape, lambda i: (0, 0)),
            ],
            # lane-dense packed output tile: rows = [sigma | r | g | b]
            out_specs=pl.BlockSpec((4, tm), lambda i: (0, i)),
        ),
        compiler_params=pltpu.CompilerParams(
            dimension_semantics=("parallel",),
            vmem_limit_bytes=vmem_limit),
    )(x_t, wslab)


# --------------------------- parameter construction -------------------------
def kaiming_linear(key, fan_in, fan_out):
    """kaiming_normal_(mode='fan_in', nonlinearity='relu'); bias = 0.

    Stored as (in, out) so the reference does x @ W (== torch x @ W.T)."""
    std = math.sqrt(2.0 / fan_in)
    w = jax.random.normal(key, (fan_in, fan_out), dtype=jnp.float32) * std
    b = jnp.zeros((1, fan_out), dtype=jnp.float32)
    return w, b


def init_mlp_params(key, d_enc, cfg):
    hd = cfg["hidden_dim_sigma"]
    hdc = cfg["hidden_dim_color"]
    keys = jax.random.split(key, 5)
    w1, b1 = kaiming_linear(keys[0], d_enc, hd)       # sigma hidden layer
    ws, bs = kaiming_linear(keys[1], hd, 1)           # sigma output layer
    wc1, bc1 = kaiming_linear(keys[2], hd + 3, hdc)   # color layer 1 (feat+dirs)
    wc2, bc2 = kaiming_linear(keys[3], hdc, hdc)      # color layer 2
    wc3, bc3 = kaiming_linear(keys[4], hdc, 3)        # color output layer
    return dict(w1=w1, b1=b1, ws=ws, bs=bs, wc1=wc1, bc1=bc1,
                wc2=wc2, bc2=bc2, wc3=wc3, bc3=bc3)


def pack_weight_slab(params, layout):
    """Pack all MLP weights/biases into one lane-aligned bf16 (rows, 128) slab."""
    d_enc, hd, hdc = layout["d_enc"], layout["hd"], layout["hdc"]
    r_w1, r_waf, r_wad = layout["r_w1"], layout["r_waf"], layout["r_wad"]
    r_w2, r_w3 = layout["r_w2"], layout["r_w3"]
    w1, b1 = params["w1"], params["b1"]
    ws, bs = params["ws"], params["bs"]
    wc1, bc1 = params["wc1"], params["bc1"]
    wc2, bc2 = params["wc2"], params["bc2"]
    wc3, bc3 = params["wc3"], params["bc3"]

    slab = jnp.zeros((layout["rows"], LANES), dtype=jnp.float32)
    # W1t: lanes [enc | dirs(=0) | b1]
    slab = slab.at[r_w1:r_w1 + hd, 0:d_enc].set(w1.T)
    slab = slab.at[r_w1:r_w1 + hd, d_enc + 3].set(b1[0])
    # Wa_feat: rows [color-h1 (wc1 feat part) | ones(=0) | sigma (ws)]
    slab = slab.at[r_waf:r_waf + hdc, 0:hd].set(wc1[:hd].T)
    slab = slab.at[r_waf + hdc + 1, 0:hd].set(ws[:, 0])
    # Wa_dir: lanes [dirs (wc1 dirs part) | bias]; ones row -> 1, sigma row -> bs
    slab = slab.at[r_wad:r_wad + hdc, 0:3].set(wc1[hd:hd + 3].T)
    slab = slab.at[r_wad:r_wad + hdc, 3].set(bc1[0])
    slab = slab.at[r_wad + hdc, 3].set(1.0)
    slab = slab.at[r_wad + hdc + 1, 3].set(bs[0, 0])
    # W2t: wc2 + bc2 via the ones lane; propagate ones and sigma channels
    slab = slab.at[r_w2:r_w2 + hdc, 0:hdc].set(wc2.T)
    slab = slab.at[r_w2:r_w2 + hdc, hdc].set(bc2[0])
    slab = slab.at[r_w2 + hdc, hdc].set(1.0)
    slab = slab.at[r_w2 + hdc + 1, hdc + 1].set(1.0)
    # W3t: row 0 = sigma pass-through, rows 1:4 = rgb logits (wc3 + bc3)
    slab = slab.at[r_w3, hdc + 1].set(1.0)
    slab = slab.at[r_w3 + 1:r_w3 + 4, 0:hdc].set(wc3.T)
    slab = slab.at[r_w3 + 1:r_w3 + 4, hdc].set(bc3[0])
    return slab.astype(jnp.bfloat16)


def build_hash_tables(key, cfg):
    L = cfg["hash_levels"]
    T = cfg["hash_table_size"]
    F = cfg["hash_features_per_level"]
    tables = jax.random.uniform(key, (L, T, F), dtype=jnp.float32,
                                minval=-1e-4, maxval=1e-4)
    resolutions = [
        int(math.floor(cfg["hash_base_resolution"]
                       * cfg["hash_growth_factor"] ** lvl))
        for lvl in range(L)
    ]
    return tables, resolutions


# ------------------------------ model forward -------------------------------
def nerf_forward(pts_norm, dirs, tables, resolutions, wslab, layout,
                 max_tm, vmem_limit):
    original_shape = pts_norm.shape[:-1]
    pts_flat = pts_norm.reshape(-1, pts_norm.shape[-1])
    dirs_flat = dirs.reshape(-1, dirs.shape[-1]).astype(jnp.float32)

    encoded = hash_encode(pts_flat, tables, resolutions)       # (N, d_enc)
    n = encoded.shape[0]

    # single concatenate -> feature-major bf16 tile: rows = [enc | dirs | 1]
    x = jnp.concatenate(
        [encoded, dirs_flat, jnp.ones((n, 1), jnp.float32)], axis=-1)
    x_t = jnp.transpose(x).astype(jnp.bfloat16)                # (d_in, N)
    assert x_t.shape[0] == layout["d_in"]

    tm = _pick_tm(n, max_tm)
    n_pad = _round_up(n, tm)
    if n_pad != n:                                             # zero-pad points
        x_t = jnp.pad(x_t, ((0, 0), (0, n_pad - n)))

    out = nerf_mlp_pallas(x_t, wslab, layout, tm, vmem_limit)  # (4, n_pad) f32
    sigma = out[0, :n].reshape(original_shape)
    rgb = jnp.transpose(out[1:4, :n]).reshape(*original_shape, 3)
    return sigma, rgb


# ---------------------------- pure-JAX reference -----------------------------
def nerf_reference(pts_norm, dirs, tables, resolutions, params):
    original_shape = pts_norm.shape[:-1]
    pts_flat = pts_norm.reshape(-1, 3)
    dirs_flat = dirs.reshape(-1, 3).astype(jnp.float32)
    enc = hash_encode(pts_flat, tables, resolutions)
    feat = jax.nn.relu(enc @ params["w1"] + params["b1"])
    sigma = jax.nn.relu(feat @ params["ws"] + params["bs"])[:, 0]
    sumsq = jnp.sum(dirs_flat * dirs_flat, axis=-1, keepdims=True)
    dn = dirs_flat * jax.lax.rsqrt(jnp.maximum(sumsq, 1e-24))
    h = jax.nn.relu(jnp.concatenate([feat, dn], axis=-1) @ params["wc1"]
                    + params["bc1"])
    h = jax.nn.relu(h @ params["wc2"] + params["bc2"])
    rgb = jax.nn.sigmoid(h @ params["wc3"] + params["bc3"])
    return sigma.reshape(original_shape), rgb.reshape(*original_shape, 3)


# ----------------------------------- main -----------------------------------
if __name__ == "__main__":
    cfg = CONFIG
    key = jax.random.PRNGKey(0)
    k_pts, k_dirs, k_tab, k_par = jax.random.split(key, 4)

    # small deterministic inputs: rays laid out as (2, 128) points
    batch_shape = (2, 128)
    pts_norm = jax.random.uniform(k_pts, batch_shape + (3,), dtype=jnp.float32)
    dirs = jax.random.normal(k_dirs, batch_shape + (3,), dtype=jnp.float32)

    tables, resolutions = build_hash_tables(k_tab, cfg)
    d_enc = cfg["hash_levels"] * cfg["hash_features_per_level"]
    params = init_mlp_params(k_par, d_enc, cfg)
    layout = make_layout(d_enc, cfg["hidden_dim_sigma"], cfg["hidden_dim_color"])
    wslab = pack_weight_slab(params, layout)
    max_tm, vmem_limit = _device_defaults()

    sigma, rgb = nerf_forward(pts_norm, dirs, tables, resolutions, wslab,
                              layout, max_tm=max_tm, vmem_limit=vmem_limit)
    jax.block_until_ready((sigma, rgb))

    # shape / range checks (match the PyTorch forward contract)
    assert sigma.shape == batch_shape
    assert rgb.shape == batch_shape + (3,)
    assert bool(jnp.all(sigma >= 0.0))
    assert bool(jnp.all((rgb >= 0.0) & (rgb <= 1.0)))

    # validate against a pure-JAX f32 reference (loose tolerance: bf16 MXU operands)
    sigma_ref, rgb_ref = nerf_reference(pts_norm, dirs, tables, resolutions, params)
    assert float(jnp.max(jnp.abs(rgb - rgb_ref))) < 3e-2
    assert float(jnp.max(jnp.abs(sigma - sigma_ref))) < 3e-3

    print("KERNEL_OK")
</pallas_src>

<mosaic_0001>
module attributes {stable_mosaic.version = 11 : i64} {
  func.func @kernel(%arg0: i32, %arg1: memref<12x128xbf16, #tpu.memory_space<vmem>>, %arg2: memref<320x128xbf16, #tpu.memory_space<vmem>>, %arg3: memref<4x128xf32, #tpu.memory_space<vmem>>) attributes {dimension_semantics = [#tpu.dimension_semantics<parallel>], iteration_bounds = array<i64: 2>, scalar_prefetch = 0 : i64, scratch_operands = 0 : i64, tpu.core_type = #tpu.core_type<tc>, window_params = [{transform_indices = @transform_0, window_bounds = array<i64: 12, 128>}, {pipeline_mode = #tpu.pipeline_mode<synchronous>, transform_indices = @transform_1, window_bounds = array<i64: 320, 128>}, {transform_indices = @transform_2, window_bounds = array<i64: 4, 128>}]} {
    %c0 = arith.constant 0 : index
    %c0_0 = arith.constant 0 : index
    %0 = vector.load %arg1[%c0, %c0_0] : memref<12x128xbf16, #tpu.memory_space<vmem>>, vector<12x128xbf16>
    %c0_1 = arith.constant 0 : index
    %c0_2 = arith.constant 0 : index
    %1 = vector.load %arg2[%c0_1, %c0_2] : memref<320x128xbf16, #tpu.memory_space<vmem>>, vector<64x12xbf16>
    %cst = arith.constant dense<0.000000e+00> : vector<64x128xf32>
    %2 = tpu.matmul %1, %0, %cst {dimension_numbers = #tpu.dot_dimension_numbers<[1], [0], [0], [1], [0, 0, 1, 1], [], []>} : vector<64x12xbf16>, vector<12x128xbf16>, vector<64x128xf32> -> vector<64x128xf32>
    %cst_3 = arith.constant 0.000000e+00 : f32
    %3 = vector.broadcast %cst_3 : f32 to vector<64x128xf32>
    %4 = arith.maximumf %2, %3 : vector<64x128xf32>
    %5 = vector.extract_strided_slice %0 {offsets = [8, 0], sizes = [4, 128], strides = [1, 1]} : vector<12x128xbf16> to vector<4x128xbf16>
    %6 = arith.extf %5 : vector<4x128xbf16> to vector<4x128xf32>
    %7 = vector.extract_strided_slice %6 {offsets = [0, 0], sizes = [3, 128], strides = [1, 1]} : vector<4x128xf32> to vector<3x128xf32>
    %8 = vector.extract_strided_slice %6 {offsets = [0, 0], sizes = [3, 128], strides = [1, 1]} : vector<4x128xf32> to vector<3x128xf32>
    %9 = arith.mulf %7, %8 : vector<3x128xf32>
    %cst_4 = arith.constant dense<0.000000e+00> : vector<128xf32>
    %10 = vector.multi_reduction <add>, %9, %cst_4 [0] : vector<3x128xf32> to vector<128xf32>
    %11 = vector.shape_cast %10 : vector<128xf32> to vector<1x128xf32>
    %cst_5 = arith.constant 1.000000e-24 : f32
    %12 = vector.broadcast %cst_5 : f32 to vector<1x128xf32>
    %13 = arith.maximumf %11, %12 : vector<1x128xf32>
    %14 = math.rsqrt %13 : vector<1x128xf32>
    %15 = tpu.iota {dimensions = array<i32: 0>} : vector<4x1xi32>
    %c3_i32 = arith.constant 3 : i32
    %16 = vector.broadcast %c3_i32 : i32 to vector<4x1xi32>
    %17 = arith.cmpi slt, %15, %16 : vector<4x1xi32>
    %cst_6 = arith.constant 1.000000e+00 : f32
    %18 = vector.shape_cast %17 : vector<4x1xi1> to vector<4x1xi1>
    %19 = vector.broadcast %18 : vector<4x1xi1> to vector<4x128xi1>
    %20 = vector.shape_cast %14 : vector<1x128xf32> to vector<1x128xf32>
    %21 = vector.broadcast %20 : vector<1x128xf32> to vector<4x128xf32>
    %22 = vector.broadcast %cst_6 : f32 to vector<4x128xf32>
    %23 = arith.select %19, %21, %22 : vector<4x128xi1>, vector<4x128xf32>
    %24 = arith.mulf %6, %23 : vector<4x128xf32>
    %c64 = arith.constant 64 : index
    %c0_7 = arith.constant 0 : index
    %25 = vector.load %arg2[%c64, %c0_7] : memref<320x128xbf16, #tpu.memory_space<vmem>>, vector<66x64xbf16>
    %c144 = arith.constant 144 : index
    %c0_8 = arith.constant 0 : index
    %26 = vector.load %arg2[%c144, %c0_8] : memref<320x128xbf16, #tpu.memory_space<vmem>>, vector<66x4xbf16>
    %27 = arith.truncf %4 : vector<64x128xf32> to vector<64x128xbf16>
    %cst_9 = arith.constant dense<0.000000e+00> : vector<66x128xf32>
    %28 = tpu.matmul %25, %27, %cst_9 {dimension_numbers = #tpu.dot_dimension_numbers<[1], [0], [0], [1], [0, 0, 1, 1], [], []>} : vector<66x64xbf16>, vector<64x128xbf16>, vector<66x128xf32> -> vector<66x128xf32>
    %29 = arith.truncf %24 : vector<4x128xf32> to vector<4x128xbf16>
    %cst_10 = arith.constant dense<0.000000e+00> : vector<66x128xf32>
    %30 = tpu.matmul %26, %29, %cst_10 {dimension_numbers = #tpu.dot_dimension_numbers<[1], [0], [0], [1], [0, 0, 1, 1], [], []>} : vector<66x4xbf16>, vector<4x128xbf16>, vector<66x128xf32> -> vector<66x128xf32>
    %31 = arith.addf %28, %30 : vector<66x128xf32>
    %cst_11 = arith.constant 0.000000e+00 : f32
    %32 = vector.broadcast %cst_11 : f32 to vector<66x128xf32>
    %33 = arith.maximumf %31, %32 : vector<66x128xf32>
    %c224 = arith.constant 224 : index
    %c0_12 = arith.constant 0 : index
    %34 = vector.load %arg2[%c224, %c0_12] : memref<320x128xbf16, #tpu.memory_space<vmem>>, vector<66x66xbf16>
    %35 = arith.truncf %33 : vector<66x128xf32> to vector<66x128xbf16>
    %cst_13 = arith.constant dense<0.000000e+00> : vector<66x128xf32>
    %36 = tpu.matmul %34, %35, %cst_13 {dimension_numbers = #tpu.dot_dimension_numbers<[1], [0], [0], [1], [0, 0, 1, 1], [], []>} : vector<66x66xbf16>, vector<66x128xbf16>, vector<66x128xf32> -> vector<66x128xf32>
    %cst_14 = arith.constant 0.000000e+00 : f32
    %37 = vector.broadcast %cst_14 : f32 to vector<66x128xf32>
    %38 = arith.maximumf %36, %37 : vector<66x128xf32>
    %c304 = arith.constant 304 : index
    %c0_15 = arith.constant 0 : index
    %39 = vector.load %arg2[%c304, %c0_15] : memref<320x128xbf16, #tpu.memory_space<vmem>>, vector<4x66xbf16>
    %40 = arith.truncf %38 : vector<66x128xf32> to vector<66x128xbf16>
    %cst_16 = arith.constant dense<0.000000e+00> : vector<4x128xf32>
    %41 = tpu.matmul %39, %40, %cst_16 {dimension_numbers = #tpu.dot_dimension_numbers<[1], [0], [0], [1], [0, 0, 1, 1], [], []>} : vector<4x66xbf16>, vector<66x128xbf16>, vector<4x128xf32> -> vector<4x128xf32>
    %c0_i32 = arith.constant 0 : i32
    %42 = vector.broadcast %c0_i32 : i32 to vector<4x1xi32>
    %43 = arith.cmpi eq, %15, %42 : vector<4x1xi32>
    %44 = arith.negf %41 : vector<4x128xf32>
    %45 = math.exp %44 : vector<4x128xf32>
    %cst_17 = arith.constant 1.000000e+00 : f32
    %46 = vector.broadcast %cst_17 : f32 to vector<4x128xf32>
    %47 = arith.addf %46, %45 : vector<4x128xf32>
    %48 = arith.divf %46, %47 : vector<4x128xf32>
    %49 = vector.shape_cast %43 : vector<4x1xi1> to vector<4x1xi1>
    %50 = vector.broadcast %49 : vector<4x1xi1> to vector<4x128xi1>
    %51 = arith.select %50, %41, %48 : vector<4x128xi1>, vector<4x128xf32>
    %c0_18 = arith.constant 0 : index
    %c0_19 = arith.constant 0 : index
    %52 = vector.load %arg3[%c0_18, %c0_19] : memref<4x128xf32, #tpu.memory_space<vmem>>, vector<4x128xf32>
    tpu.vector_store %arg3[%c0_18, %c0_19], %51 {strides = array<i32>} : memref<4x128xf32, #tpu.memory_space<vmem>>, vector<4x128xf32>,
    return
  }
  func.func @transform_0(%arg0: i32) -> (i32, i32) {
    %c0_i32 = arith.constant 0 : i32
    %c0_i32_0 = arith.constant 0 : i32
    return %c0_i32, %arg0 : i32, i32
  }
  func.func @transform_1(%arg0: i32) -> (i32, i32) {
    %c0_i32 = arith.constant 0 : i32
    %c0_i32_0 = arith.constant 0 : i32
    %c0_i32_1 = arith.constant 0 : i32
    return %c0_i32, %c0_i32_0 : i32, i32
  }
  func.func @transform_2(%arg0: i32) -> (i32, i32) {
    %c0_i32 = arith.constant 0 : i32
    %c0_i32_0 = arith.constant 0 : i32
    return %c0_i32, %arg0 : i32, i32
  }
}

</mosaic_0001>

<bundles_post_ra>
// kernel: tpu_custom_call.1
= control target key start
LH: loop header
LB: loop body
LE: loop exit
PB: predicated region body
PF: predicated region fallthrough
CT: control target
= control target key end

     0   :  { %7 = vsyncpa [#allocation3], 0  ;;  %s1598_s0 = inlined_call_operand.hbm [shape: bf16[12,256], index: 0, kind: input, shape index: {}]   ;;  %s1599_s1 = inlined_call_operand.hbm [shape: bf16[320,128], index: 1, kind: input, shape index: {}]   ;;  %s1600_s2 = inlined_call_operand.hbm [shape: f32[4,256], index: 2, kind: output, shape index: {}]  }
   0x1   :  { %9 = vsyncpa [#allocation3 + $0x1], 0 }
   0x2   :  { %10 = vsyncpa [#allocation6], 0 }
   0x3   :  { %11 = vsyncpa [#allocation4], 0 }
   0x4   :  { %13 = vsyncpa [#allocation4 + $0x1], 0  ;;  %s1331_s9 = smov 0   ;;  %s1333_s10 = smov 0  }
   0x5   :  { %s1335_s11 = smov 0   ;;  %s1337_s12 = smov 0  }
   0x6 LB: > { %s1352_s13 = sadd.s32 4294967295, %s1306_s12   ;;  %s874_s14 = sadd.s32 4294967294, %s1306_s12   ;;  %s1306_s12 = sphi %s1337_s12, %s1624_s12   ;;  %s1302_s11 = sphi %s1335_s11, %s1623_s11   ;;  %s1298_s10 = sphi %s1333_s10, %s1622_s10   ;;  %s1294_s9 = sphi %s1331_s9, %s1621_s9  }
   0x7   : > { %s1356_s15 = sadd.s32 1, %s1306_s12   ;;  %s26_s16 = sadd.s32 1, %s1302_s11 }
   0x8   : > { %s23_s17 = ssub.s32 %s1306_s12, %s1356_s15  ;;  %p33_p0 = scmp.ne.s32.totalorder %s1302_s11, %s1298_s10 }
   0x9   : > { %p24_p1 = scmp.eq.s32.totalorder %s23_s17, 0  ;;  %p34_p2 = scmp.eq.s32.totalorder %s1306_s12, 0 }
   0xa   : > { %p39_p3 = scmp.ne.s32.totalorder %s1298_s10, %s1294_s9  ;;  %p1601_p4 = scmp.eq.s32.totalorder %s1352_s13, 0 }
   0xb   : > { %s1368_s18 = scalar_select %p24_p1, %s1302_s11, %s26_s16  }
   0xc   : > { %p1370_p5 = por %p34_p2, %p33_p0  ;;  %p1376_p6 = por %p1601_p4, %p39_p3 }
   0xd   : > { %p84_p7 = scmp.eq.s32.totalorder %s1352_s13, 1  ;;  %p90_p8 = scmp.eq.s32.totalorder %s874_s14, 1 }
   0xe   : > { %s1605_s19 = scalar_select %p1370_p5, 1, 0 }
   0xf   : > { %s1606_s20 = scalar_select %p1376_p6, 1, 0 }
  0x10   : > { %p875_p9 = scmp.ge.s32.totalorder %s1306_s12, 1  ;;  %p97_p10 = scmp.lt.s32.totalorder %s1306_s12, 3 }
  0x11   : > { %p1383_p11 = por %p84_p7, %p33_p0  ;;  %p1387_p12 = por %p90_p8, %p39_p3 }
  0x12   : > { %p1391_p13 = pnand %p875_p9, %p97_p10  ;;  %s1308_s24 = smov [#allocation5]  }
  0x13   : > { %s1607_s21 = scalar_select %p1383_p11, 1, 0 }
  0x14   : > { %s1608_s22 = scalar_select %p1387_p12, 1, 0 }
  0x15   : > { %s1609_s23 = scalar_select %p1391_p13, 1, 0 }
  0x16   : > { %p1098_p1 = pneg %p1391_p13  ;;  %s109_s25 = sshll.u32 %s1308_s24, 4  ;;  %s110_s25 = int_to_ptr.vmem [resolvable:$true] %s109_s25 }
  0x17   : > { %s123_s27 = sand.u32 1, %s1302_s11   ;;  %s1178_s30 = scalar_lea.hbm %s1599_s1, 2560 }
  0x18   : > { %p1399_p2 = pnand %p1098_p1, %p1601_p4  ;;  %p1179_p7 = scmp.ne.s32.totalorder %s1599_s1, %s1178_s30 }
  0x19   : > { %p1185_p1 = scmp.lt.u32.totalorder %s1178_s30, %s1599_s1 }
  0x1a   : > { %p1180_p8 = pneg %p1399_p2 }
  0x1c   : > { %p1181_p9 = pnand %p1180_p8, %p1179_p7 }
  0x1e   : > { %p1182_p10 = pneg %p1181_p9 }
  0x20   : > { %p1187_p4 = pnand %p1185_p1, %p1182_p10 }
  0x22   : > { %1190 = shalt.err (!%p1187_p4)
}
  0x23   : > { %s1191_s7 = scalar_lea.vmem %s110_s25, 2560  ;;  %p1199_p11 = scmp.lt.s32.totalorder %s110_s25, %s110_s25 }
  0x24   : > { %p1192_p0 = scmp.ne.s32.totalorder %s110_s25, %s1191_s7  ;;  %p1200_p6 = scmp.lt.s32.totalorder %s1191_s7, %s1191_s7 }
  0x26   : > { %p1194_p3 = pnand %p1192_p0, %p1180_p8  ;;  %p1201_p13 = por %p1200_p6, %p1199_p11 }
  0x28   : > { %p1195_p12 = pneg %p1194_p3 }
  0x2a   : > { %p1202_p5 = pnand %p1201_p13, %p1195_p12 }
  0x2c   : > { %1205 = shalt.err (!%p1202_p5)
}
  0x2d   : > { %s1309_s8 = smov 64   ;;  %s1310_s14 = smov 4  }
  0x2e   : > { %1101 = dma.hbm_to_vmem [thread:$0]  (!%p1399_p2), %s1599_s1, 2560, %s110_s25, [#allocation6], %s1309_s8, %s1309_s8, %s1310_s14  }
  0x2f   : > { %p1611_p4 = scmp.ne.s32.totalorder %s1605_s19, 0  ;;  %p1612_p0 = scmp.lt.s32.totalorder %s1306_s12, 2 }
  0x30   : > { %s878_s28 = sshll.u32 %s123_s27, 3  ;;  %s879_s29 = sshll.u32 %s1306_s12, 6 }
  0x31   : > { %p1429_p3 = pnand %p1612_p0, %p1611_p4  ;;  %s1437_s26 = scalar_lea.hbm %s1598_s0, %s879_s29 }
  0x32   : > { %s127_s25 = scalar_lea.vmem [#allocation2], %s878_s28  ;;  %s1441_s4 = scalar_lea.sflag [#allocation3], %s123_s27 }
  0x33   : > { %s133_s19 = sshll.u32 %s127_s25, 4  ;;  %s1206_s5 = scalar_lea.hbm %s1437_s26, 128  ;;  %s1439_s19 = int_to_ptr.vmem [resolvable:$true] %s133_s19 }
  0x34   : > { %p1207_p5 = scmp.ne.s32.totalorder %s1437_s26, %s1206_s5  ;;  %p1208_p6 = pneg %p1429_p3 }
  0x35   : > { %s1211_s16 = scalar_lea.hbm %s1598_s0, 256  ;;  %p1212_p13 = scmp.lt.u32.totalorder %s1437_s26, %s1598_s0 }
  0x36   : > { %p1209_p11 = pnand %p1208_p6, %p1207_p5  ;;  %p1213_p2 = scmp.lt.u32.totalorder %s1211_s16, %s1206_s5 }
  0x37   : > { %p1215_p8 = scmp.lt.u32.totalorder %s1206_s5, %s1437_s26 }
  0x38   : > { %p1210_p12 = pneg %p1209_p11  ;;  %p1214_p7 = por %p1213_p2, %p1212_p13 }
  0x3a   : > { %p1216_p9 = por %p1215_p8, %p1214_p7 }
  0x3c   : > { %p1217_p10 = pnand %p1216_p9, %p1210_p12 }
  0x3e   : > { %1220 = shalt.err (!%p1217_p10)
}
  0x3f   : > { %s1221_s27 = scalar_lea.vmem %s1439_s19, 128  ;;  %s1311_s28 = smov [#allocation2]  }
  0x40   : > { %p1222_p1 = scmp.ne.s32.totalorder %s1439_s19, %s1221_s27  ;;  %s1226_s30 = sshll.u32 %s1311_s28, 4  ;;  %s1227_s30 = int_to_ptr.vmem [resolvable:$false] %s1226_s30 }
  0x41   : > { %s1228_s3 = scalar_lea.vmem %s1227_s30, 256  ;;  %p1229_p5 = scmp.lt.s32.totalorder %s1439_s19, %s1227_s30 }
  0x42   : > { %p1224_p4 = pnand %p1222_p1, %p1208_p6  ;;  %p1230_p11 = scmp.lt.s32.totalorder %s1228_s3, %s1221_s27 }
  0x44   : > { %p1225_p0 = pneg %p1224_p4  ;;  %p1231_p13 = por %p1230_p11, %p1229_p5 }
  0x46   : > { %p1232_p2 = pnand %p1231_p13, %p1225_p0 }
  0x48   : > { %1235 = shalt.err (!%p1232_p2)
}
  0x49   : > { %s1312_s25 = smov 128   ;;  %p1614_p6 = scmp.ne.s32.totalorder %s1609_s23, 0 }
  0x4a   : > { %1105 = dma.hbm_to_vmem [thread:$0]  (!%p1429_p3), %s1437_s26, 128, %s1439_s19, %s1441_s4, %s1312_s25, %s1309_s8, %s1310_s14  }
  0x4b   : > { %145 = sbr.rel (%p1614_p6) target bundleno = 1085 (0x43d), region = 28  ;;  %s1474_s5 = sand.u32 (!%p1614_p6), 1, %s1298_s10  }
  0x4c   : > { %s881_s6 = sshll.u32 (!%p1614_p6), %s1474_s5, 3  ;;  %s148_s7 = scalar_lea.sflag (!%p1614_p6), [#allocation3], %s1474_s5 }
  0x4d   : > { %s151_s16 = scalar_lea.vmem (!%p1614_p6), [#allocation2], %s881_s6  ;;  %p1615_p12 = scmp.ne.s32.totalorder (!%p1614_p6), %s1606_s20, 0 }
  0x52   : > { %1281 = dma.done.wait (%p1615_p12), %s148_s7, 128  }
  0x53   : > { %1283 = vsyncadd (%p1615_p12), %s148_s7, 4294967168  ;;  %p1616_p7 = scmp.eq.s32.totalorder %s1352_s13, 0 }
  0x55   : > { %1285 = dma.done.wait (%p1616_p7), [#allocation6], 2560   ;;  %p1617_p3 = pmov %p1616_p7 }
  0x56   : > { %v1313_v0 = vmov 0.0   ;;  %vm1314_vm0 = vmmov 0   ;;  %vm225_vm1 = vcmask 1045504   ;;  %vm212_vm2 = vcmask 97280   ;;  %v177_v1 = vld [vmem:[%s151_s16] sm:$0xf] }
  0x57   : > { %1287 = vsyncadd (%p1617_p3), [#allocation6], 4294964736  ;;  %975 = vmatprep.subr.bf16.mxu1 %v1313_v0  ;;  %977 = vmatprep.mubr.msk.bf16.mxu1 %vm1314_vm0, %v1313_v0  ;;  %v178_v2 = vld [vmem:[%s151_s16 + $0x4] sm:$0x3]  ;;  %v1153_v5 = vld [vmem:[#allocation5] sm:$0xff]   ;;  %vm304_vm3 = vcmask 1042432   ;;  %v314_v19 = vlaneseq }
  0x58   : > { %v888_v3 = vcombine.low %v177_v1, %v178_v2  ;;  %v302_v4 = vunpack.c.l.bf16 %v178_v2  ;;  %967 = vmatprep.mubr.msk.bf16.mxu0 %vm212_vm2, %v1153_v5  ;;  %v1154_v8 = vld [vmem:[#allocation5 + $0x8] sm:$0xff]   ;;  %v1155_v9 = vld [vmem:[#allocation5 + $0x10] sm:$0xff]   ;;  %v1156_v14 = vld [vmem:[#allocation5 + $0x18] sm:$0xff]   ;;  %vm383_vm5 = vcmask 1041408   ;;  %vm367_vm6 = vcmask 31744   ;;  %s883_s20 = sshll.u32 %s1474_s5, 2 }
  0x59   : > { %v1496_v20 = vshrl.u32 %v314_v19, 7  ;;  %v1157_v26 = vld [vmem:[#allocation5 + $0x48] sm:$0xff]   ;;  %v1158_v27 = vld [vmem:[#allocation5 + $0x50] sm:$0xff]   ;;  %v1159_v28 = vld [vmem:[#allocation5 + $0x58] sm:$0xff]   ;;  %vm482_vm7 = vcmask 523264   ;;  %vm632_vm8 = vcmask 1040384  }
  0x5a   : > { %1089 = vmatprep.subr.msk.bf16.mxu0 %vm225_vm1, %v888_v3  ;;  %v303_v6 = vmul.f32 %v302_v4, %v302_v4  ;;  %v227_v7 = vsel %vm225_vm1, %v888_v3, 0  ;;  %v1160_v29 = vld [vmem:[#allocation5 + $0x60] sm:$0xff]   ;;  %v1161_v30 = vld [vmem:[#allocation5 + $0x68] ss:$0 sps:$4 sm:$0x11]   ;;  %v1164_v53 = vld [vmem:[#allocation5 + $0x30] sm:$0xff]  }
  0x5b   : > { %966 = vmatpush3.bf16.msra.mxu0 %v227_v7  ;;  %vm316_vm4 = vcmp.lt.s32.totalorder %v1496_v20, 3  ;;  %v1162_v51 = vld [vmem:[#allocation5 + $0x20] sm:$0xff]   ;;  %v1163_v52 = vld [vmem:[#allocation5 + $0x28] sm:$0xff]   ;;  %v1165_v54 = vld [vmem:[#allocation5 + $0x38] sm:$0xff]   ;;  %vm616_vm9 = vcmask 539648   ;;  %s926_s23 = sshll.u32 %s1352_s13, 6 }
  0x5c   : > { %v305_v10 = vsel %vm304_vm3, %v303_v6, 0.0  ;;  %1025 = vmatprep.subr.bf16.mxu0 %v1313_v0  ;;  %v1166_v55 = vld [vmem:[#allocation5 + $0x40] ss:$0 sps:$4 sm:$0x11]   ;;  %s175_s8 = scalar_lea.vmem [#allocation7], %s883_s20  ;;  %vm769_vm10 = vcmp.eq.s32.totalorder %v1496_v20, 0  ;;  %s1554_s19 = scalar_lea.hbm %s1600_s2, %s926_s23 }
  0x5d   : > { %v306_v11 = vrot.slane %v305_v10, 4  ;;  %s794_s14 = sshll.u32 %s175_s8, 4  ;;  %s781_s4 = scalar_lea.sflag [#allocation4], %s1474_s5  ;;  %s1556_s14 = int_to_ptr.vmem [resolvable:$true] %s794_s14 }
  0x5e   : > { %968 = vmatmul.mubr.msk.bf16.vlgmr.msra.gmra.mrb[0].mxu0 %vm212_vm2, %v1154_v8  ;;  %s1236_s17 = scalar_lea.vmem %s1556_s14, 64  ;;  %p1618_p9 = scmp.ne.s32.totalorder %s1607_s21, 0 }
  0x5f   : > { %v307_v12 = vadd.f32 %v306_v11, %v305_v10  ;;  %971 = vmatprep.mubr.msk.bf16.mxu0 %vm212_vm2, %v1155_v9  ;;  %p1237_p8 = scmp.ne.s32.totalorder %s1556_s14, %s1236_s17  ;;  %s1315_s13 = smov [#allocation7]  }
  0x60   : > { %s1240_s29 = sshll.u32 %s1315_s13, 4  ;;  %s1241_s29 = int_to_ptr.vmem [resolvable:$false] %s1240_s29 }
  0x61   : > { %v308_v13 = vrot.slane %v307_v12, 2  ;;  %p1238_p10 = pnand %p1237_p8, %p1618_p9  ;;  %s1242_s27 = scalar_lea.vmem %s1241_s29, 128 }
  0x62   : > { %p1243_p4 = scmp.lt.s32.totalorder %s1556_s14, %s1241_s29  ;;  %p1244_p0 = scmp.lt.s32.totalorder %s1242_s27, %s1236_s17 }
  0x63   : > { %v309_v15 = vadd.f32 %v308_v13, %v307_v12  ;;  %p1239_p1 = pneg %p1238_p10 }
  0x64   : > { %p1245_p5 = por %p1244_p0, %p1243_p4 }
  0x65   : > { %v310_v16 = vrot.slane %v309_v15, 1 }
  0x66   : > { %972 = vmatmul.mubr.msk.bf16.gmra.mrb[4].mxu0 %vm212_vm2, %v1156_v14  ;;  %p1246_p11 = pnand %p1245_p5, %p1239_p1 }
  0x67   : > { %v311_v17 = vadd.f32 %v310_v16, %v309_v15  ;;  %1035 = vmatprep.mubr.msk.bf16.mxu0 %vm1314_vm0, %v1313_v0 }
  0x69   : > { %v312_v18 = vmax.f32 %v311_v17, 1e-24 }
  0x6b   : > { %1172 = vrsqrt.f32 %v312_v18 }
  0x75   : > { %v1173_v21 = vpop.eup %1172 }
  0x76   : > { %v319_v22 = vsel %vm316_vm4, %v1173_v21, 1.0 }
  0x77   : > { %v320_v23 = vmul.f32 %v319_v22, %v302_v4 }
  0x79   : > { %v343_v24 = vpack.c.bf16 %v320_v23, %v320_v23 }
  0x7b   : > { %v385_v25 = vsel %vm383_vm5, %v343_v24, 0 }
  0x7c   : > { %976 = vmatpush3.bf16.msra.mxu1 %v385_v25 }
  0x7d   : > { %997 = vmatprep.subr.bf16.mxu1 %v1313_v0 }
  0x7f   : > { %978 = vmatmul.mubr.msk.bf16.vlgmr.msra.gmra.mrb[0].mxu1 %vm367_vm6, %v1157_v26 }
  0x80   : > { %981 = vmatprep.mubr.msk.bf16.mxu1 %vm1314_vm0, %v1313_v0 }
  0x87   : > { %982 = vmatmul.mubr.msk.bf16.gmra.mrb[4].mxu1 %vm367_vm6, %v1158_v27 }
  0x88   : > { %985 = vmatprep.mubr.msk.bf16.mxu1 %vm1314_vm0, %v1313_v0 }
  0x8f   : > { %986 = vmatmul.mubr.msk.bf16.gmra.mrb[8].mxu1 %vm367_vm6, %v1159_v28 }
  0x90   : > { %989 = vmatprep.mubr.msk.bf16.mxu1 %vm1314_vm0, %v1313_v0 }
  0x97   : > { %990 = vmatmul.mubr.msk.bf16.gmra.mrb[12].mxu1 %vm367_vm6, %v1160_v29  ;;  %v1167_v29 = vld [vmem:[#allocation5 + $0x70] sm:$0xff]  }
  0x98   : > { %993 = vmatprep.mubr.msk.bf16.mxu1 %vm1314_vm0, %v1313_v0 }
  0x9f   : > { %994 = vmatmul.mubr.msk.bf16.gmra.mrb[16].mxu1 %vm367_vm6, %v1161_v30  ;;  %v1168_v30 = vld [vmem:[#allocation5 + $0x78] sm:$0xff]  }
  0xa0   : > { %1005 = vmatprep.mubr.msk.bf16.mxu1 %vm1314_vm0, %v1313_v0 }
 0x131   : > { %v969_v31 = vpop.f32.mrb[0].mxu0 }
 0x132   : > { %v263_v32 = vpop.f32.mrb[1].mxu0  ;;  %v296_v34 = vmax.f32 %v969_v31, 0.0  ;;  %v1169_v31 = vld [vmem:[#allocation5 + $0x80] sm:$0xff]  }
 0x133   : > { %v970_v33 = vpop.f32.mrb[2].mxu0  ;;  %v294_v37 = vmax.f32 %v263_v32, 0.0  ;;  %v1170_v32 = vld [vmem:[#allocation5 + $0x88] sm:$0xff]  }
 0x134   : > { %v297_v35 = vmax.f32 %v970_v33, 0.0  ;;  %v266_v36 = vpop.f32.mrb[3].mxu0  ;;  %v1171_v33 = vld [vmem:[#allocation5 + $0x90] ss:$0 sps:$4 sm:$0x11]  }
 0x135   : > { %v295_v38 = vmax.f32 %v266_v36, 0.0 }
 0x136   : > { %v340_v39 = vpack.c.bf16 %v297_v35, %v296_v34 }
 0x137   : > { %v339_v40 = vpack.c.bf16 %v295_v38, %v294_v37 }
 0x139   : > { %v973_v41 = vpop.f32.mrb[4].mxu0  ;;  %998 = vmatpush3.bf16.msra.mxu1 %v339_v40 }
 0x13a   : > { %v279_v42 = vpop.f32.mrb[5].mxu0  ;;  %999 = vmatprep.subr.bf16.mxu1 %v1313_v0  ;;  %v300_v44 = vmax.f32 %v973_v41, 0.0 }
 0x13b   : > { %v974_v43 = vpop.f32.mrb[6].mxu0  ;;  %v298_v47 = vmax.f32 %v279_v42, 0.0 }
 0x13c   : > { %v301_v45 = vmax.f32 %v974_v43, 0.0  ;;  %v282_v46 = vpop.f32.mrb[7].mxu0 }
 0x13d   : > { %v299_v48 = vmax.f32 %v282_v46, 0.0  ;;  %1000 = vmatpush3.bf16.msra.mxu1 %v340_v39 }
 0x13e   : > { %v342_v49 = vpack.c.bf16 %v301_v45, %v300_v44  ;;  %1001 = vmatprep.subr.bf16.mxu1 %v1313_v0 }
 0x13f   : > { %v341_v50 = vpack.c.bf16 %v299_v48, %v298_v47 }
 0x141   : > { %1002 = vmatpush3.bf16.msra.mxu1 %v341_v50 }
 0x142   : > { %1003 = vmatprep.subr.bf16.mxu1 %v1313_v0 }
 0x145   : > { %1004 = vmatpush3.bf16.msra.mxu1 %v342_v49 }
 0x148   : > { %1006 = vmatmul.mubr.msk.bf16.vlgmr.msra.gmra.mrb[0].mxu1 %vm482_vm7, %v1162_v51 }
 0x149   : > { %1009 = vmatprep.mubr.msk.bf16.mxu1 %vm1314_vm0, %v1313_v0 }
 0x150   : > { %1010 = vmatmul.mubr.msk.bf16.gmra.mrb[4].mxu1 %vm482_vm7, %v1163_v52 }
 0x151   : > { %1013 = vmatprep.mubr.msk.bf16.mxu1 %vm1314_vm0, %v1313_v0 }
 0x158   : > { %1014 = vmatmul.mubr.msk.bf16.gmra.mrb[8].mxu1 %vm482_vm7, %v1164_v53 }
 0x159   : > { %1017 = vmatprep.mubr.msk.bf16.mxu1 %vm1314_vm0, %v1313_v0 }
 0x160   : > { %1018 = vmatmul.mubr.msk.bf16.gmra.mrb[12].mxu1 %vm482_vm7, %v1165_v54 }
 0x161   : > { %1021 = vmatprep.mubr.msk.bf16.mxu1 %vm1314_vm0, %v1313_v0 }
 0x168   : > { %1022 = vmatmul.mubr.msk.bf16.gmra.mrb[16].mxu1 %vm482_vm7, %v1166_v55 }
 0x21b   : > { %v532_v56 = vpop.f32.mrb[0].mxu1 }
 0x21c   : > { %v1007_v57 = vpop.f32.mrb[1].mxu1  ;;  %v570_v59 = vmax.f32 %v532_v56, 0.0 }
 0x21d   : > { %v535_v58 = vpop.f32.mrb[2].mxu1 }
 0x21e   : > { %v571_v60 = vmax.f32 %v535_v58, 0.0  ;;  %v1008_v61 = vpop.f32.mrb[3].mxu1 }
 0x220   : > { %v588_v62 = vpack.c.bf16 %v571_v60, %v570_v59 }
 0x222   : > { %1026 = vmatpush3.bf16.msra.mxu0 %v588_v62 }
 0x223   : > { %v540_v63 = vpop.f32.mrb[4].mxu1  ;;  %1027 = vmatprep.subr.bf16.mxu0 %v1313_v0 }
 0x224   : > { %v1011_v1 = vpop.f32.mrb[5].mxu1  ;;  %v572_v3 = vmax.f32 %v540_v63, 0.0 }
 0x225   : > { %v543_v2 = vpop.f32.mrb[6].mxu1 }
 0x226   : > { %v573_v4 = vmax.f32 %v543_v2, 0.0  ;;  %v1012_v5 = vpop.f32.mrb[7].mxu1 }
 0x228   : > { %v589_v6 = vpack.c.bf16 %v573_v4, %v572_v3 }
 0x22a   : > { %1028 = vmatpush3.bf16.msra.mxu0 %v589_v6  ;;  %v717_v6 = vld [vmem:[#allocation5 + $0x98] sm:$0x3] }
 0x22b   : > { %v548_v7 = vpop.f32.mrb[8].mxu1  ;;  %1029 = vmatprep.subr.bf16.mxu0 %v1313_v0 }
 0x22c   : > { %v1015_v8 = vpop.f32.mrb[9].mxu1  ;;  %v574_v10 = vmax.f32 %v548_v7, 0.0 }
 0x22d   : > { %v551_v9 = vpop.f32.mrb[10].mxu1 }
 0x22e   : > { %v575_v11 = vmax.f32 %v551_v9, 0.0  ;;  %v1016_v12 = vpop.f32.mrb[11].mxu1 }
 0x230   : > { %v590_v13 = vpack.c.bf16 %v575_v11, %v574_v10 }
 0x232   : > { %1030 = vmatpush3.bf16.msra.mxu0 %v590_v13 }
 0x233   : > { %v556_v14 = vpop.f32.mrb[12].mxu1  ;;  %1031 = vmatprep.subr.bf16.mxu0 %v1313_v0 }
 0x234   : > { %v1019_v15 = vpop.f32.mrb[13].mxu1  ;;  %v576_v17 = vmax.f32 %v556_v14, 0.0 }
 0x235   : > { %v559_v16 = vpop.f32.mrb[14].mxu1 }
 0x236   : > { %v577_v18 = vmax.f32 %v559_v16, 0.0  ;;  %v1020_v19 = vpop.f32.mrb[15].mxu1 }
 0x238   : > { %v591_v21 = vpack.c.bf16 %v577_v18, %v576_v17 }
 0x23a   : > { %1032 = vmatpush3.bf16.msra.mxu0 %v591_v21 }
 0x23b   : > { %v564_v22 = vpop.f32.mrb[16].mxu1  ;;  %1033 = vmatprep.subr.bf16.mxu0 %v1313_v0 }
 0x23c   : > { %v578_v23 = vmax.f32 %v564_v22, 0.0  ;;  %v1023_v24 = vpop.f32.mrb[17].mxu1 }
 0x23d   : > { %v567_v25 = vpop.f32.mrb[18].mxu1 }
 0x23e   : > { %v592_v26 = vpack.c.bf16 %v578_v23, %v578_v23  ;;  %v1024_v27 = vpop.f32.mrb[19].mxu1 }
 0x240   : > { %v634_v28 = vsel %vm632_vm8, %v592_v26, 0 }
 0x241   : > { %1034 = vmatpush3.bf16.msra.mxu0 %v634_v28 }
 0x242   : > { %1055 = vmatprep.subr.bf16.mxu0 %v1313_v0 }
 0x244   : > { %1036 = vmatmul.mubr.msk.bf16.vlgmr.msra.gmra.mrb[8].mxu0 %vm616_vm9, %v1167_v29 }
 0x245   : > { %1039 = vmatprep.mubr.msk.bf16.mxu0 %vm1314_vm0, %v1313_v0 }
 0x24c   : > { %1040 = vmatmul.mubr.msk.bf16.gmra.mrb[12].mxu0 %vm616_vm9, %v1168_v30 }
 0x24d   : > { %1043 = vmatprep.mubr.msk.bf16.mxu0 %vm1314_vm0, %v1313_v0 }
 0x254   : > { %1044 = vmatmul.mubr.msk.bf16.gmra.mrb[16].mxu0 %vm616_vm9, %v1169_v31 }
 0x255   : > { %1047 = vmatprep.mubr.msk.bf16.mxu0 %vm1314_vm0, %v1313_v0 }
 0x25c   : > { %1048 = vmatmul.mubr.msk.bf16.gmra.mrb[20].mxu0 %vm616_vm9, %v1170_v32 }
 0x25d   : > { %1051 = vmatprep.mubr.msk.bf16.mxu0 %vm1314_vm0, %v1313_v0 }
 0x264   : > { %1052 = vmatmul.mubr.msk.bf16.gmra.mrb[24].mxu0 %vm616_vm9, %v1171_v33 }
 0x265   : > { %1065 = vmatprep.mubr.msk.bf16.mxu0 %vm1314_vm0, %v1313_v0 }
 0x317   : > { %v670_v34 = vpop.f32.mrb[8].mxu0 }
 0x318   : > { %v1037_v35 = vpop.f32.mrb[9].mxu0  ;;  %v708_v37 = vmax.f32 %v670_v34, 0.0 }
 0x319   : > { %v673_v36 = vpop.f32.mrb[10].mxu0 }
 0x31a   : > { %v709_v38 = vmax.f32 %v673_v36, 0.0  ;;  %v1038_v39 = vpop.f32.mrb[11].mxu0 }
 0x31c   : > { %v718_v40 = vpack.c.bf16 %v709_v38, %v708_v37 }
 0x31e   : > { %1056 = vmatpush3.bf16.msra.mxu0 %v718_v40 }
 0x31f   : > { %v678_v41 = vpop.f32.mrb[12].mxu0  ;;  %1057 = vmatprep.subr.bf16.mxu0 %v1313_v0 }
 0x320   : > { %v1041_v42 = vpop.f32.mrb[13].mxu0  ;;  %v710_v44 = vmax.f32 %v678_v41, 0.0 }
 0x321   : > { %v681_v43 = vpop.f32.mrb[14].mxu0 }
 0x322   : > { %v711_v45 = vmax.f32 %v681_v43, 0.0  ;;  %v1042_v46 = vpop.f32.mrb[15].mxu0 }
 0x324   : > { %v719_v47 = vpack.c.bf16 %v711_v45, %v710_v44 }
 0x326   : > { %1058 = vmatpush3.bf16.msra.mxu0 %v719_v47 }
 0x327   : > { %v686_v48 = vpop.f32.mrb[16].mxu0  ;;  %1059 = vmatprep.subr.bf16.mxu0 %v1313_v0 }
 0x328   : > { %v1045_v49 = vpop.f32.mrb[17].mxu0  ;;  %v712_v51 = vmax.f32 %v686_v48, 0.0 }
 0x329   : > { %v689_v50 = vpop.f32.mrb[18].mxu0 }
 0x32a   : > { %v713_v52 = vmax.f32 %v689_v50, 0.0  ;;  %v1046_v53 = vpop.f32.mrb[19].mxu0 }
 0x32c   : > { %v720_v54 = vpack.c.bf16 %v713_v52, %v712_v51 }
 0x32e   : > { %1060 = vmatpush3.bf16.msra.mxu0 %v720_v54 }
 0x32f   : > { %v694_v55 = vpop.f32.mrb[20].mxu0  ;;  %1061 = vmatprep.subr.bf16.mxu0 %v1313_v0 }
 0x330   : > { %v1049_v56 = vpop.f32.mrb[21].mxu0  ;;  %v714_v58 = vmax.f32 %v694_v55, 0.0 }
 0x331   : > { %v697_v57 = vpop.f32.mrb[22].mxu0 }
 0x332   : > { %v715_v59 = vmax.f32 %v697_v57, 0.0  ;;  %v1050_v60 = vpop.f32.mrb[23].mxu0 }
 0x334   : > { %v721_v61 = vpack.c.bf16 %v715_v59, %v714_v58 }
 0x336   : > { %1062 = vmatpush3.bf16.msra.mxu0 %v721_v61 }
 0x337   : > { %v702_v62 = vpop.f32.mrb[24].mxu0  ;;  %1063 = vmatprep.subr.bf16.mxu0 %v1313_v0 }
 0x338   : > { %v716_v63 = vmax.f32 %v702_v62, 0.0  ;;  %v1053_v1 = vpop.f32.mrb[25].mxu0 }
 0x339   : > { %v705_v2 = vpop.f32.mrb[26].mxu0 }
 0x33a   : > { %v722_v3 = vpack.c.bf16 %v716_v63, %v716_v63  ;;  %v1054_v4 = vpop.f32.mrb[27].mxu0 }
 0x33c   : > { %v727_v5 = vsel %vm632_vm8, %v722_v3, 0 }
 0x33d   : > { %1064 = vmatpush3.bf16.msra.mxu0 %v727_v5 }
 0x340   : > { %1066 = vmatmul.mubr.msk.bf16.vlgmr.msra.gmra.mrb[28].mxu0 %vm616_vm9, %v717_v6 }
 0x413   : > { %v763_v7 = vpop.f32.mrb[28].mxu0 }
 0x414   : > { %v924_v8 = vmul.f32 -1.442695, %v763_v7  ;;  %v1067_v9 = vpop.f32.mrb[29].mxu0 }
 0x415   : > { %v766_v10 = vpop.f32.mrb[30].mxu0 }
 0x416   : > { %1174 = vpow2.f32 %v924_v8  ;;  %v1068_v0 = vpop.f32.mrb[31].mxu0 }
 0x420   : > { %v1175_v11 = vpop.eup %1174 }
 0x421   : > { %v773_v12 = vadd.f32 1.0, %v1175_v11 }
 0x423   : > { %1176 = vrcp.f32 %v773_v12 }
 0x42d   : > { %v1177_v13 = vpop.eup %1176 }
 0x42e   : > { %v778_v14 = vsel %vm769_vm10, %v763_v7, %v1177_v13 }
 0x42f   : > { %779 = vst [vmem:[%s175_s8] sm:$0xf] %v778_v14 }
 0x430   : > { %1249 = shalt.err (!%p1246_p11)
}
 0x431   : > { %s1250_s28 = scalar_lea.hbm %s1554_s19, 64  ;;  %s1254_s25 = scalar_lea.hbm %s1600_s2, 128 }
 0x432   : > { %p1251_p13 = scmp.ne.s32.totalorder %s1554_s19, %s1250_s28  ;;  %p1255_p12 = scmp.lt.u32.totalorder %s1554_s19, %s1600_s2 }
 0x433   : > { %p1256_p7 = scmp.lt.u32.totalorder %s1254_s25, %s1250_s28  ;;  %p1258_p8 = scmp.lt.u32.totalorder %s1250_s28, %s1554_s19 }
 0x434   : > { %p1252_p2 = pnand %p1251_p13, %p1618_p9 }
 0x435   : > { %p1257_p3 = por %p1256_p7, %p1255_p12 }
 0x436   : > { %p1253_p6 = pneg %p1252_p2 }
 0x437   : > { %p1259_p10 = por %p1258_p8, %p1257_p3 }
 0x439   : > { %p1260_p1 = pnand %p1259_p10, %p1253_p6 }
 0x43b   : > { %1263 = shalt.err (!%p1260_p1)
}
 0x43c   : > { %1096 = dma.vmem_to_hbm [thread:$0]  (%p1618_p9), %s1556_s14, 64, %s1554_s19, %s781_s4  }
 0x43d PF: > { %s806_s7 = sand.u32 1, %s1294_s9   ;;  %p1619_p4 = scmp.ne.s32.totalorder %s1608_s22, 0 }
 0x43e   : > { %p1620_p0 = scmp.ge.s32.totalorder %s1306_s12, 2  ;;  %s807_s16 = scalar_lea.sflag [#allocation4], %s806_s7 }
 0x440   : > { %p1107_p5 = pnand %p1620_p0, %p1619_p4 }
 0x442   : > { %1289 = dma.done.wait (!%p1107_p5), %s807_s16, 64  }
 0x443   : > { %1291 = vsyncadd (!%p1107_p5), %s807_s16, 4294967232  ;;  %p16_p11 = scmp.ge.s32.totalorder %s1356_s15, 4   ;;  %s1621_s9 = smov %s1298_s10 }
 0x444   : > { %s1622_s10 = smov %s1302_s11  ;;  %s1623_s11 = smov %s1368_s18 }
 0x445   : > { %s1624_s12 = smov %s1356_s15  ;;  %18 = sbr.rel (!%p16_p11) target bundleno = 6 (0x6), region = 77 }
 0x44c   :  { %812 = vsyncpa [#allocation3], 1 }
 0x44d   :  { %814 = vsyncpa [#allocation3 + $0x1], 1 }
 0x44e   :  { %815 = vsyncpa [#allocation6], 1 }
 0x44f   :  { %816 = vsyncpa [#allocation4], 1 }
 0x450   :  { %818 = vsyncpa [#allocation4 + $0x1], 1 }

</bundles_post_ra>
